<compile_context>
chip_gen: v5e
topology: v5e:2x2
jax: 0.10.0
libtpu: 0.0.40
codegen_flags: <defaults>
</compile_context>

<pallas_src>
import jax
import jax.numpy as jnp
from jax.experimental import pallas as pl
from jax.experimental.pallas import tpu as pltpu

# Arrays smaller than this skip the kernel entirely (pure identity, the
# pallas_call would be 100% overhead).
_KERNEL_BYTES_THRESHOLD = 4 << 20


def _identity_kernel(x_ref, o_ref):
    # Pure pass-through copy of the current VMEM tile.
    o_ref[...] = x_ref[...]


def _block_budget():
    """(target_block_bytes, vmem_limit_bytes) tuned per TPU generation."""
    try:
        vmem = pltpu.get_tpu_info().vmem_capacity_bytes
    except Exception:  # unknown chip / query unavailable: stay conservative
        return 3 << 20, None  # 4x block = 12 MiB fits v5e's 16 MiB scoped default
    if vmem is not None and vmem <= (64 << 20):
        # v7x: 64 MiB physical VMEM, ~3.2 TB/s HBM -> amortize the ~0.35 us/step
        # overhead with 8 MiB blocks (4x block = 32 MiB scoped, well under 64 MiB).
        return 8 << 20, 32 << 20
    # v5e / v6e: 128 MiB physical VMEM. 4 MiB blocks (4x = 16 MiB) are already in
    # the ~85% of-roofline regime; raise the scoped limit for headroom.
    return 4 << 20, 32 << 20


def _pick_lane_cols(total, cap_lanes=8192):
    """Largest multiple of 128 that divides `total`, capped at `cap_lanes`."""
    if total % 128 != 0:
        return None
    m = total // 128
    k = min(m, cap_lanes // 128)
    while k > 1 and m % k:
        k -= 1
    return 128 * k


def _pick_tile_rows(rows, row_bytes, itemsize, target_bytes):
    """Byte-budgeted row tile, rounded to the packed-sublane multiple."""
    sub = max(8, 32 // max(itemsize, 1))  # 8 for f32, 16 for bf16, 32 for int8/fp8
    if rows <= sub:
        return rows
    tr = max(sub, (target_bytes // max(row_bytes, 1)) // sub * sub)
    if tr >= rows:
        # Whole array would be one block; split into >= 2 grid steps so both
        # v7x TensorCores' DMA engines run concurrently (neutral on 1-TC chips).
        if rows >= 2 * sub:
            half = (rows + 1) // 2
            tr = -(-half // sub) * sub
        else:
            tr = rows
    return min(tr, rows)


def _identity_2d(x2d, tile_rows, vmem_limit_bytes):
    rows, cols = x2d.shape
    nbytes = rows * cols * jnp.dtype(x2d.dtype).itemsize
    cp_kwargs = {"dimension_semantics": ("parallel",)}
    if vmem_limit_bytes is not None:
        cp_kwargs["vmem_limit_bytes"] = vmem_limit_bytes
    return pl.pallas_call(
        _identity_kernel,
        out_shape=jax.ShapeDtypeStruct((rows, cols), x2d.dtype),
        grid_spec=pltpu.PrefetchScalarGridSpec(
            num_scalar_prefetch=0,
            grid=(pl.cdiv(rows, tile_rows),),
            in_specs=[pl.BlockSpec((tile_rows, cols), lambda i: (i, 0))],
            out_specs=pl.BlockSpec((tile_rows, cols), lambda i: (i, 0)),
        ),
        # Purely mem-bound: 1x read + 1x write of the array, zero flops.
        cost_estimate=pl.CostEstimate(
            flops=0, transcendentals=0, bytes_accessed=2 * int(nbytes)
        ),
        compiler_params=pltpu.CompilerParams(**cp_kwargs),
    )(x2d)


def print_layer_forward(x, use_kernel=None):
    """JAX/Pallas equivalent of PrintLayer.forward(x).

    use_kernel: None -> auto (kernel only for arrays >= 4 MiB),
                True -> force the Pallas identity kernel,
                False -> pure pass-through.
    """
    # Mirror `print(x.shape, x.dtype)` from the PyTorch module.
    # TODO(synk): under jit this fires once at trace time, not per eager call;
    # per-call printing would need jax.debug.print at a perf cost.
    print(tuple(x.shape), x.dtype)

    if x.size == 0:
        return x

    itemsize = jnp.dtype(x.dtype).itemsize
    total = int(x.size)
    nbytes = total * itemsize

    if use_kernel is None:
        use_kernel = nbytes >= _KERNEL_BYTES_THRESHOLD
    if not use_kernel:
        # Optimal identity: no HBM round trip at all.
        return x

    # Lane-dense 2-D slab: layout is free for an identity, so put a large
    # multiple of 128 on the lane (last) axis for unmasked full-vreg stores.
    cols = _pick_lane_cols(total)
    if cols is None:
        # Element count not a multiple of 128: a kernel would need masked
        # partial stores for zero benefit — just return the input.
        return x

    orig_shape = x.shape
    x2d = x.reshape(-1, cols)
    rows = x2d.shape[0]

    target_bytes, vmem_limit_bytes = _block_budget()
    tile_rows = _pick_tile_rows(rows, cols * itemsize, itemsize, target_bytes)

    out2d = _identity_2d(x2d, tile_rows, vmem_limit_bytes)
    return out2d.reshape(orig_shape)


if __name__ == "__main__":
    key = jax.random.PRNGKey(0)
    # Small NCHW input consistent with a conv-style model: batch=2, C=4, H=W=16.
    x = jax.random.normal(key, (2, 4, 16, 16), dtype=jnp.float32)

    # Default path: identity short-circuit (no kernel launched for 8 KiB).
    y_fast = print_layer_forward(x)
    assert y_fast.shape == x.shape and y_fast.dtype == x.dtype

    # Force the Pallas identity kernel once so it is exercised on TPU.
    y = print_layer_forward(x, use_kernel=True)
    y = jax.block_until_ready(y)

    assert y.shape == x.shape and y.dtype == x.dtype
    assert bool(jnp.array_equal(y, x))
    assert bool(jnp.array_equal(y_fast, x))
    print("KERNEL_OK")
</pallas_src>

<mosaic_0001>
module attributes {stable_mosaic.version = 11 : i64} {
  func.func @_identity_kernel(%arg0: i32, %arg1: memref<1x2048xf32, #tpu.memory_space<vmem>>, %arg2: memref<1x2048xf32, #tpu.memory_space<vmem>>) attributes {dimension_semantics = [#tpu.dimension_semantics<parallel>], iteration_bounds = array<i64: 1>, scalar_prefetch = 0 : i64, scratch_operands = 0 : i64, tpu.core_type = #tpu.core_type<tc>, window_params = [{transform_indices = @transform_0, window_bounds = array<i64: 1, 2048>}, {transform_indices = @transform_1, window_bounds = array<i64: 1, 2048>}]} {
    %c0 = arith.constant 0 : index
    %c0_0 = arith.constant 0 : index
    %0 = vector.load %arg1[%c0, %c0_0] : memref<1x2048xf32, #tpu.memory_space<vmem>>, vector<1x2048xf32>
    %c0_1 = arith.constant 0 : index
    %c0_2 = arith.constant 0 : index
    %1 = vector.load %arg2[%c0_1, %c0_2] : memref<1x2048xf32, #tpu.memory_space<vmem>>, vector<1x2048xf32>
    tpu.vector_store %arg2[%c0_1, %c0_2], %0 {strides = array<i32>} : memref<1x2048xf32, #tpu.memory_space<vmem>>, vector<1x2048xf32>,
    return
  }
  func.func @transform_0(%arg0: i32) -> (i32, i32) {
    %c0_i32 = arith.constant 0 : i32
    %c0_i32_0 = arith.constant 0 : i32
    return %arg0, %c0_i32 : i32, i32
  }
  func.func @transform_1(%arg0: i32) -> (i32, i32) {
    %c0_i32 = arith.constant 0 : i32
    %c0_i32_0 = arith.constant 0 : i32
    return %arg0, %c0_i32 : i32, i32
  }
}

</mosaic_0001>

<bundles_post_ra>
// kernel: tpu_custom_call.1
= control target key start
LH: loop header
LB: loop body
LE: loop exit
PB: predicated region body
PF: predicated region fallthrough
CT: control target
= control target key end

     0   :  { %6 = vsyncpa [#allocation3], 0  ;;  %s116_s0 = inlined_call_operand.hbm [shape: f32[1,2048], index: 0, kind: input, shape index: {}]   ;;  %s117_s1 = inlined_call_operand.hbm [shape: f32[1,2048], index: 1, kind: output, shape index: {}]  }
   0x1   :  { %7 = vsyncpa [#allocation4], 0  ;;  %s13_s8 = sshll.u32 %s116_s0, 4  ;;  %s98_s9 = smov [#allocation2]   ;;  %s14_s8 = int_to_ptr.hbm [resolvable:$true] %s13_s8 }
   0x2   :  { %s15_s10 = sshll.u32 %s98_s9, 4  ;;  %s16_s10 = int_to_ptr.vmem [resolvable:$true] %s15_s10 }
   0x3   :  { %18 = dma.hbm_to_vmem [thread:$0]  %s14_s8, 256, %s16_s10, [#allocation3]  }
   0x4   :  { %94 = dma.done.wait [#allocation3], 256  }
   0x5   :  { %95 = vsyncadd [#allocation3], 4294967040  ;;  %s99_s11 = smov [#allocation5]   ;;  %s34_s15 = sshll.u32 %s117_s1, 4  ;;  %v23_v0 = vld [vmem:[#allocation2] sm:$0xff]  ;;  %v24_v1 = vld [vmem:[#allocation2 + $0x8] sm:$0xff]  ;;  %s35_s15 = int_to_ptr.hbm [resolvable:$true] %s34_s15 }
   0x6   :  { %s32_s12 = sshll.u32 %s99_s11, 4  ;;  %25 = vst [vmem:[#allocation5] sm:$0xff] %v23_v0  ;;  %s33_s12 = int_to_ptr.vmem [resolvable:$true] %s32_s12 }
   0x7   :  { %26 = vst [vmem:[#allocation5 + $0x8] sm:$0xff] %v24_v1 }
   0x8   :  { %37 = dma.vmem_to_hbm [thread:$0]  %s33_s12, 256, %s35_s15, [#allocation4]  }
   0x9   :  { %96 = dma.done.wait [#allocation4], 256  }
   0xa   :  { %97 = vsyncadd [#allocation4], 4294967040 }
   0xb   :  { %42 = vsyncpa [#allocation3], 1 }
   0xc   :  { %43 = vsyncpa [#allocation4], 1 }

</bundles_post_ra>
